<compile_context>
chip_gen: v5e
topology: v5e:2x2
jax: 0.10.0
libtpu: 0.0.40
codegen_flags: <defaults>
</compile_context>

<pallas_src>
import functools
import math

import jax
import jax.numpy as jnp
from jax.experimental import pallas as pl
from jax.experimental.pallas import tpu as pltpu


# ----------------------------------------------------------------------------
# Pure-python xxh32 (deterministic replacement for the `xxhash` package, used
# only at parameter-construction time on the host, exactly like __init__).
# ----------------------------------------------------------------------------
_P1, _P2, _P3, _P4, _P5 = 2654435761, 2246822519, 3266489917, 668265263, 374761393
_M32 = 0xFFFFFFFF


def _rotl(x, r):
    return ((x << r) | (x >> (32 - r))) & _M32


def xxh32(data: bytes, seed: int = 0) -> int:
    n = len(data)
    i = 0
    if n >= 16:
        v1 = (seed + _P1 + _P2) & _M32
        v2 = (seed + _P2) & _M32
        v3 = seed & _M32
        v4 = (seed - _P1) & _M32
        while i + 16 <= n:
            for k, v in enumerate((v1, v2, v3, v4)):
                lane = int.from_bytes(data[i + 4 * k:i + 4 * k + 4], "little")
                v = (v + lane * _P2) & _M32
                v = (_rotl(v, 13) * _P1) & _M32
                if k == 0:
                    v1 = v
                elif k == 1:
                    v2 = v
                elif k == 2:
                    v3 = v
                else:
                    v4 = v
            i += 16
        h = (_rotl(v1, 1) + _rotl(v2, 7) + _rotl(v3, 12) + _rotl(v4, 18)) & _M32
    else:
        h = (seed + _P5) & _M32
    h = (h + n) & _M32
    while i + 4 <= n:
        k = int.from_bytes(data[i:i + 4], "little")
        h = (h + k * _P3) & _M32
        h = (_rotl(h, 17) * _P4) & _M32
        i += 4
    while i < n:
        h = (h + data[i] * _P5) & _M32
        h = (_rotl(h, 11) * _P1) & _M32
        i += 1
    h ^= h >> 15
    h = (h * _P2) & _M32
    h ^= h >> 13
    h = (h * _P3) & _M32
    h ^= h >> 16
    return h


def build_weight_idx(hN, size_out, size_in, hash_seed=2, extra_str="idxW"):
    """Equivalent of HashEmbeddingBag.hash_func: (size_out, size_in) int32 in [0, hN)."""
    import numpy as np
    idx = np.empty((size_out, size_in), dtype=np.int32)
    for i in range(size_out):
        for j in range(size_in):
            key = "{}_{}{}".format(i, j, extra_str).encode()
            idx[i, j] = xxh32(key, hash_seed) % hN
    return jnp.asarray(idx)


# ----------------------------------------------------------------------------
# Chip-aware defaults.
# ----------------------------------------------------------------------------
def _device_kind():
    try:
        return jax.devices()[0].device_kind.lower()
    except Exception:  # pragma: no cover - defensive
        return ""


def _defaults_for_chip():
    """(native MXU M, MXU compute dtype, #TensorCores per chip) per generation."""
    kind = _device_kind()
    if "v7" in kind:
        return 256, jnp.bfloat16, 2   # v7x: 2x256^2 bf16 MXU, 2 TCs, 64 MiB VMEM
    if "v6" in kind:
        return 256, jnp.bfloat16, 1   # v6e: 2x256^2 bf16 MXU
    return 128, jnp.float32, 1        # v5e/v5p/v4/unknown: 128-wide MXU, f32 path


def _round_up(x, m):
    return ((x + m - 1) // m) * m


# ----------------------------------------------------------------------------
# Pallas kernel: per batch tile, build (TILE_B, v_chunk) bag counts in int32
# (no (B, L, V) one-hot materialized), cast once, and feed the MXU with a
# counts @ W chunked matmul accumulated into out_ref.
# Out-of-range ids contribute zero counts (used for batch padding rows).
# ----------------------------------------------------------------------------
def hash_embedding_bag_kernel(x_ref, w_ref, out_ref, *, v_chunk):
    # x_ref:   (TILE_B, L)   int32     ids for this batch tile (-1 = padding)
    # w_ref:   (Vp, Dp)      f32/bf16  dense hashed-shared weight (resident)
    # out_ref: (TILE_B, Dp)  f32
    tb, L = x_ref.shape
    Vp, _ = w_ref.shape

    x = x_ref[...]                                               # (TILE_B, L)

    first = True
    for v0 in range(0, Vp, v_chunk):                             # static unroll
        vc = min(v_chunk, Vp - v0)
        iota_v = jax.lax.broadcasted_iota(jnp.int32, (tb, vc), 1) + v0

        # int32 compare+add over the (small, static) bag length; single cast
        # to the MXU dtype after the loop keeps the VPU work minimal.
        counts = jnp.zeros((tb, vc), jnp.int32)
        for l in range(L):
            counts = counts + (x[:, l:l + 1] == iota_v).astype(jnp.int32)

        partial = jnp.dot(counts.astype(w_ref.dtype), w_ref[v0:v0 + vc, :],
                          preferred_element_type=jnp.float32)
        if first:
            out_ref[...] = partial
            first = False
        else:
            out_ref[...] += partial


def hash_embedding_bag_forward(x, hashed_weight, weight_idx, mode="sum",
                               tile_b=None):
    """x: (B, L) int32 bags. Returns (B, embedding_dim) float32."""
    assert mode == "sum", "only mode='sum' is implemented"
    # TODO(synk): 1-D input + `offsets` variant of F.embedding_bag not implemented.
    B, L = x.shape
    V, D = weight_idx.shape

    native_m, compute_dtype, n_cores = _defaults_for_chip()

    # --- dense W from the hashed weight vector (gather hoisted to XLA) ------
    # weight_idx is static per module; cache the result across calls whenever
    # hashed_weight is unchanged (eval/inference) to skip this HBM round trip.
    W = jnp.take(hashed_weight, weight_idx, axis=0).astype(compute_dtype)    # (V, D)

    # Lane-dense output & MXU-friendly K: pad D to 128 lanes and V to the
    # sublane pack of the compute dtype.  Skip the pad entirely when aligned.
    sub = 16 if compute_dtype == jnp.bfloat16 else 8
    Dp = _round_up(D, 128)
    Vp = _round_up(V, sub)
    if Dp != D or Vp != V:
        W = jnp.pad(W, ((0, Vp - V), (0, Dp - D)))

    # --- batch tiling: MXU-native M, clamped to the batch --------------------
    if tile_b is None:
        tile_b = min(native_m, _round_up(B, 8))
        # v7x: keep >= 2 grid steps when possible so both TensorCores get work.
        if n_cores > 1 and B > tile_b // 2 and _round_up(B, tile_b) // tile_b < 2:
            if B > 8:
                tile_b = max(8, _round_up(pl.cdiv(B, 2), 8))
    Bp = _round_up(B, tile_b)

    # Filler ids (-1) are out of range -> zero counts -> padded rows are zero.
    x_padded = x.astype(jnp.int32)
    if Bp != B:
        x_padded = jnp.pad(x_padded, ((0, Bp - B), (0, 0)), constant_values=-1)

    # Keep the int32 counts intermediate <= ~128 KiB (~32 vregs) per chunk.
    v_chunk = max(sub, min(Vp, ((128 * 1024 // (4 * tile_b)) // sub) * sub))

    # --- explicit VMEM budget -------------------------------------------------
    itemsize = jnp.dtype(compute_dtype).itemsize
    w_bytes = Vp * Dp * itemsize                  # single-buffered (constant map)
    x_bytes = 2 * tile_b * L * 4                  # double-buffered input tile
    out_bytes = 2 * tile_b * Dp * 4               # double-buffered output tile
    scratch_bytes = tile_b * (v_chunk * 4 + Dp * 4)
    vmem_need = int(1.3 * (w_bytes + x_bytes + out_bytes + scratch_bytes))
    cp_kwargs = dict(dimension_semantics=("parallel",))
    if vmem_need > 16 * 1024 * 1024:
        # Stay under v7x's 64 MiB physical VMEM; v5e/v6e have 128 MiB.
        cp_kwargs["vmem_limit_bytes"] = min(vmem_need, 64 * 1024 * 1024)
    # TODO(synk): for large vocabularies where W (Vp*Dp*itemsize) exceeds the
    # VMEM budget (notably v7x's 64 MiB), add a second "arbitrary" grid axis
    # over V chunks with a pl.when-initialized accumulator instead of keeping
    # W fully resident.

    # W is constant across the batch grid -> request a single VMEM buffer.
    w_spec_kwargs = {}
    if hasattr(pl, "Buffered"):
        w_spec_kwargs["pipeline_mode"] = pl.Buffered(1)
    try:
        w_spec = pl.BlockSpec((Vp, Dp), lambda i: (0, 0), **w_spec_kwargs)
    except TypeError:
        w_spec = pl.BlockSpec((Vp, Dp), lambda i: (0, 0))

    out_padded = pl.pallas_call(
        functools.partial(hash_embedding_bag_kernel, v_chunk=v_chunk),
        out_shape=jax.ShapeDtypeStruct((Bp, Dp), jnp.float32),
        grid=(Bp // tile_b,),
        in_specs=[
            pl.BlockSpec((tile_b, L), lambda i: (i, 0)),   # streamed batch tile
            w_spec,                                         # resident weight
        ],
        out_specs=pl.BlockSpec((tile_b, Dp), lambda i: (i, 0)),
        compiler_params=pltpu.CompilerParams(**cp_kwargs),
    )(x_padded, W)

    return out_padded[:B, :D]


if __name__ == "__main__":
    # Module hyperparameters (small, consistent with __init__).
    num_embeddings = 32     # V
    embedding_dim = 32      # D
    compression = 0.5
    hash_seed = 2

    hashed_weight_size = math.ceil(num_embeddings * embedding_dim * compression)  # 512

    key = jax.random.PRNGKey(0)
    k_w, k_x = jax.random.split(key)

    # Deterministic parameter init (torch.nn.init.normal(mean=0, std=1) analogue).
    hashed_weight = jax.random.normal(k_w, (hashed_weight_size,), jnp.float32)
    weight_idx = build_weight_idx(hashed_weight_size, num_embeddings,
                                  embedding_dim, hash_seed=hash_seed)

    # Example input: batch of 16 bags, 8 ids per bag.
    B, L = 16, 8
    x = jax.random.randint(k_x, (B, L), 0, num_embeddings, dtype=jnp.int32)

    fwd = jax.jit(hash_embedding_bag_forward, static_argnames=("mode", "tile_b"))
    out = fwd(x, hashed_weight, weight_idx, mode="sum")
    out = jax.block_until_ready(out)

    # Pure-JAX reference of the same forward semantics, with W rounded to the
    # same MXU compute dtype the kernel uses (bf16 on v6e/v7x, f32 on v5e).
    _, compute_dtype, _ = _defaults_for_chip()
    W_ref = hashed_weight[weight_idx].astype(compute_dtype).astype(jnp.float32)
    ref = W_ref[x].sum(axis=1)                   # (B, D)

    assert out.shape == (B, embedding_dim) and out.dtype == jnp.float32
    # Tolerance accounts for MXU summation order vs sequential f32 sum.
    assert jnp.allclose(out, ref, atol=1e-3, rtol=1e-3), "mismatch vs reference"

    print("KERNEL_OK")
</pallas_src>

<mosaic_0001>
module attributes {stable_mosaic.version = 11 : i64} {
  func.func @hash_embedding_bag_kernel(%arg0: i32, %arg1: memref<16x8xi32, #tpu.memory_space<vmem>>, %arg2: memref<32x128xf32, #tpu.memory_space<vmem>>, %arg3: memref<16x128xf32, #tpu.memory_space<vmem>>) attributes {dimension_semantics = [#tpu.dimension_semantics<parallel>], iteration_bounds = array<i64: 1>, scalar_prefetch = 0 : i64, scratch_operands = 0 : i64, tpu.core_type = #tpu.core_type<tc>, window_params = [{transform_indices = @transform_0, window_bounds = array<i64: 16, 8>}, {pipeline_mode = #tpu.pipeline_mode<synchronous>, transform_indices = @transform_1, window_bounds = array<i64: 32, 128>}, {transform_indices = @transform_2, window_bounds = array<i64: 16, 128>}]} {
    %c0 = arith.constant 0 : index
    %c0_0 = arith.constant 0 : index
    %0 = vector.load %arg1[%c0, %c0_0] : memref<16x8xi32, #tpu.memory_space<vmem>>, vector<16x8xi32>
    %1 = tpu.iota {dimensions = array<i32: 1>} : vector<16x32xi32>
    %c0_i32 = arith.constant 0 : i32
    %2 = vector.broadcast %c0_i32 : i32 to vector<16x32xi32>
    %3 = arith.addi %1, %2 : vector<16x32xi32>
    %c0_i32_1 = arith.constant 0 : i32
    %4 = vector.broadcast %c0_i32_1 : i32 to vector<16x32xi32>
    %5 = vector.extract_strided_slice %0 {offsets = [0, 0], sizes = [16, 1], strides = [1, 1]} : vector<16x8xi32> to vector<16x1xi32>
    %6 = vector.broadcast %5 : vector<16x1xi32> to vector<16x32xi32>
    %7 = arith.cmpi eq, %6, %3 : vector<16x32xi32>
    %8 = arith.extui %7 : vector<16x32xi1> to vector<16x32xi32>
    %9 = arith.addi %4, %8 : vector<16x32xi32>
    %10 = vector.extract_strided_slice %0 {offsets = [0, 1], sizes = [16, 1], strides = [1, 1]} : vector<16x8xi32> to vector<16x1xi32>
    %11 = vector.broadcast %10 : vector<16x1xi32> to vector<16x32xi32>
    %12 = arith.cmpi eq, %11, %3 : vector<16x32xi32>
    %13 = arith.extui %12 : vector<16x32xi1> to vector<16x32xi32>
    %14 = arith.addi %9, %13 : vector<16x32xi32>
    %15 = vector.extract_strided_slice %0 {offsets = [0, 2], sizes = [16, 1], strides = [1, 1]} : vector<16x8xi32> to vector<16x1xi32>
    %16 = vector.broadcast %15 : vector<16x1xi32> to vector<16x32xi32>
    %17 = arith.cmpi eq, %16, %3 : vector<16x32xi32>
    %18 = arith.extui %17 : vector<16x32xi1> to vector<16x32xi32>
    %19 = arith.addi %14, %18 : vector<16x32xi32>
    %20 = vector.extract_strided_slice %0 {offsets = [0, 3], sizes = [16, 1], strides = [1, 1]} : vector<16x8xi32> to vector<16x1xi32>
    %21 = vector.broadcast %20 : vector<16x1xi32> to vector<16x32xi32>
    %22 = arith.cmpi eq, %21, %3 : vector<16x32xi32>
    %23 = arith.extui %22 : vector<16x32xi1> to vector<16x32xi32>
    %24 = arith.addi %19, %23 : vector<16x32xi32>
    %25 = vector.extract_strided_slice %0 {offsets = [0, 4], sizes = [16, 1], strides = [1, 1]} : vector<16x8xi32> to vector<16x1xi32>
    %26 = vector.broadcast %25 : vector<16x1xi32> to vector<16x32xi32>
    %27 = arith.cmpi eq, %26, %3 : vector<16x32xi32>
    %28 = arith.extui %27 : vector<16x32xi1> to vector<16x32xi32>
    %29 = arith.addi %24, %28 : vector<16x32xi32>
    %30 = vector.extract_strided_slice %0 {offsets = [0, 5], sizes = [16, 1], strides = [1, 1]} : vector<16x8xi32> to vector<16x1xi32>
    %31 = vector.broadcast %30 : vector<16x1xi32> to vector<16x32xi32>
    %32 = arith.cmpi eq, %31, %3 : vector<16x32xi32>
    %33 = arith.extui %32 : vector<16x32xi1> to vector<16x32xi32>
    %34 = arith.addi %29, %33 : vector<16x32xi32>
    %35 = vector.extract_strided_slice %0 {offsets = [0, 6], sizes = [16, 1], strides = [1, 1]} : vector<16x8xi32> to vector<16x1xi32>
    %36 = vector.broadcast %35 : vector<16x1xi32> to vector<16x32xi32>
    %37 = arith.cmpi eq, %36, %3 : vector<16x32xi32>
    %38 = arith.extui %37 : vector<16x32xi1> to vector<16x32xi32>
    %39 = arith.addi %34, %38 : vector<16x32xi32>
    %40 = vector.extract_strided_slice %0 {offsets = [0, 7], sizes = [16, 1], strides = [1, 1]} : vector<16x8xi32> to vector<16x1xi32>
    %41 = vector.broadcast %40 : vector<16x1xi32> to vector<16x32xi32>
    %42 = arith.cmpi eq, %41, %3 : vector<16x32xi32>
    %43 = arith.extui %42 : vector<16x32xi1> to vector<16x32xi32>
    %44 = arith.addi %39, %43 : vector<16x32xi32>
    %45 = arith.sitofp %44 : vector<16x32xi32> to vector<16x32xf32>
    %c0_2 = arith.constant 0 : index
    %c0_3 = arith.constant 0 : index
    %46 = vector.load %arg2[%c0_2, %c0_3] : memref<32x128xf32, #tpu.memory_space<vmem>>, vector<32x128xf32>
    %cst = arith.constant dense<0.000000e+00> : vector<16x128xf32>
    %47 = tpu.matmul %45, %46, %cst {dimension_numbers = #tpu.dot_dimension_numbers<[1], [0], [0], [1], [0, 0, 1, 1], [], []>} : vector<16x32xf32>, vector<32x128xf32>, vector<16x128xf32> -> vector<16x128xf32>
    %c0_4 = arith.constant 0 : index
    %c0_5 = arith.constant 0 : index
    %48 = vector.load %arg3[%c0_4, %c0_5] : memref<16x128xf32, #tpu.memory_space<vmem>>, vector<16x128xf32>
    tpu.vector_store %arg3[%c0_4, %c0_5], %47 {strides = array<i32>} : memref<16x128xf32, #tpu.memory_space<vmem>>, vector<16x128xf32>,
    return
  }
  func.func @transform_0(%arg0: i32) -> (i32, i32) {
    %c0_i32 = arith.constant 0 : i32
    %c0_i32_0 = arith.constant 0 : i32
    return %arg0, %c0_i32 : i32, i32
  }
  func.func @transform_1(%arg0: i32) -> (i32, i32) {
    %c0_i32 = arith.constant 0 : i32
    %c0_i32_0 = arith.constant 0 : i32
    %c0_i32_1 = arith.constant 0 : i32
    return %c0_i32, %c0_i32_0 : i32, i32
  }
  func.func @transform_2(%arg0: i32) -> (i32, i32) {
    %c0_i32 = arith.constant 0 : i32
    %c0_i32_0 = arith.constant 0 : i32
    return %arg0, %c0_i32 : i32, i32
  }
}

</mosaic_0001>

<bundles_post_ra>
// kernel: hash_embedding_bag_forward.1
= control target key start
LH: loop header
LB: loop body
LE: loop exit
PB: predicated region body
PF: predicated region fallthrough
CT: control target
= control target key end

     0   :  { %v223_v1 = vmov 1   ;;  %v224_v2 = vmov 0   ;;  %s292_s0 = inlined_call_operand.vmem [shape: s32[16,8], index: 0, kind: input, shape index: {}]   ;;  %s293_s1 = inlined_call_operand.vmem [shape: f32[32,128], index: 1, kind: input, shape index: {}]   ;;  %s294_s2 = inlined_call_operand.hbm [shape: f32[16,128], index: 2, kind: output, shape index: {}]  }
   0x1   :  { %v12_v0 = vld [vmem:[%s292_s0] sm:$0xff]  ;;  %184 = vset.pattern.permute.xlu1 %v223_v1  ;;  %183 = vset.pattern.permute.xlu0 %v224_v2 }
   0x2   :  { %7 = vsyncpa [#allocation3], 0  ;;  %27 = vperm.xlu1 %184, %v12_v0   ;;  %17 = vperm.xlu0 %183, %v12_v0   ;;  %v225_v3 = vmov 2   ;;  %v13_v4 = vld [vmem:[%s292_s0 + $0x8] sm:$0xff]  ;;  %v226_v5 = vmov 3   ;;  %v227_v6 = vmov 4   ;;  %v14_v22 = vlaneseq }
   0x3   :  { %185 = vset.pattern.permute.xlu2 %v225_v3  ;;  %v228_v7 = vmov 5   ;;  %v229_v8 = vmov 6   ;;  %v230_v9 = vmov 7   ;;  %v115_v13 = vld [vmem:[%s293_s1 + $0x18] sm:$0xff]  ;;  %v114_v16 = vld [vmem:[%s293_s1 + $0x10] sm:$0xff]  ;;  %v113_v17 = vld [vmem:[%s293_s1 + $0x8] sm:$0xff] }
   0x4   :  { %39 = vperm.xlu2 %185, %v12_v0   ;;  %168 = vmatpush.msra.mxu1 %v115_v13  ;;  %v112_v19 = vld [vmem:[%s293_s1] sm:$0xff]  ;;  %v15_v23 = vand.u32 127, %v14_v22  ;;  %vm116_vm13 = vcmask 261120   ;;  %s231_s1 = smov [#allocation2]   ;;  %s154_s23 = sshll.u32 %s294_s2, 4  ;;  %s155_s23 = int_to_ptr.hbm [resolvable:$true] %s154_s23 }
   0x5   :  { %135 = vmatpush.msra.mxu0 %v115_v13  ;;  %s152_s20 = sshll.u32 %s231_s1, 4  ;;  %s232_s24 = smov 128   ;;  %s153_s20 = int_to_ptr.vmem [resolvable:$true] %s152_s20 }
   0x6   :  { %169 = vmatpush.msra.mxu1 %v114_v16  ;;  %s233_s25 = smov 8  }
   0x7   :  { %136 = vmatpush.msra.mxu0 %v114_v16 }
   0x8   :  { %170 = vmatpush.msra.mxu1 %v113_v17 }
   0x9   :  { %137 = vmatpush.msra.mxu0 %v113_v17 }
   0xa   :  { %30 = vperm.xlu1 %184, %v13_v4   ;;  %20 = vperm.xlu0 %183, %v13_v4  }
   0xb   :  { %171 = vmatpush.msra.mxu1 %v112_v19  ;;  %138 = vmatpush.msra.mxu0 %v112_v19 }
   0xc   :  { %42 = vperm.xlu2 %185, %v13_v4  }
  0x12   :  { %187 = vset.pattern.permute.xlu1 %v226_v5  ;;  %186 = vset.pattern.permute.xlu0 %v226_v5 }
  0x13   :  { %54 = vperm.xlu1 %187, %v13_v4   ;;  %51 = vperm.xlu0 %186, %v12_v0  }
  0x14   :  { %188 = vset.pattern.permute.xlu2 %v227_v6 }
  0x15   :  { %63 = vperm.xlu2 %188, %v12_v0  }
  0x1b   :  { %189 = vset.pattern.permute.xlu1 %v227_v6  ;;  %191 = vset.pattern.permute.xlu0 %v228_v7 }
  0x1c   :  { %66 = vperm.xlu1 %189, %v13_v4   ;;  %78 = vperm.xlu0 %191, %v13_v4  }
  0x1d   :  { %190 = vset.pattern.permute.xlu2 %v228_v7 }
  0x1e   :  { %75 = vperm.xlu2 %190, %v12_v0  }
  0x24   :  { %192 = vset.pattern.permute.xlu1 %v229_v8  ;;  %196 = vset.pattern.permute.xlu0 %v230_v9 }
  0x25   :  { %87 = vperm.xlu1 %192, %v12_v0  }
  0x26   :  { %193 = vset.pattern.permute.xlu2 %v229_v8 }
  0x27   :  { %90 = vperm.xlu2 %193, %v13_v4  }
  0x2d   :  { %194 = vset.pattern.permute.xlu1 %v230_v9 }
  0x2e   :  { %99 = vperm.xlu1 %194, %v12_v0  }
  0x2f   :  { %195 = vset.pattern.permute.xlu2 %v230_v9 }
  0x30   :  { %102 = vperm.xlu2 %195, %v13_v4  }
  0x5e   :  { %v40_v10 = vpop.permute.xlu2 %39 }
  0x5f   :  { %vm44_vm9 = vcmp.eq.s32.totalorder %v40_v10, %v15_v23 }
  0x60   :  { %v46_v45 = vsel %vm44_vm9, 1, %v224_v2 }
  0x66   :  { %v43_v11 = vpop.permute.xlu2 %42 }
  0x67   :  { %vm45_vm2 = vcmp.eq.s32.totalorder %v43_v11, %v15_v23 }
  0x68   :  { %v47_v30 = vsel %vm45_vm2, 1, %v224_v2 }
  0x6f   :  { %v256_v12 = vpop.permute.xlu2 %63 }
  0x70   :  { %vm68_vm12 = vcmp.eq.s32.totalorder %v256_v12, %v15_v23 }
  0x71   :  { %v70_v54 = vsel %vm68_vm12, 1, %v224_v2 }
  0x74   :  { %v28_v14 = vpop.permute.xlu1 %27  ;;  %v18_v15 = vpop.permute.xlu0 %17 }
  0x75   :  { %vm32_vm4 = vcmp.eq.s32.totalorder %v28_v14, %v15_v23  ;;  %vm22_vm5 = vcmp.eq.s32.totalorder %v18_v15, %v15_v23 }
  0x76   :  { %v34_v34 = vsel %vm32_vm4, 1, %v224_v2  ;;  %v24_v35 = vsel %vm22_vm5, 1, %v224_v2 }
  0x77   :  { %v36_v41 = vadd.s32 %v34_v34, %v24_v35 }
  0x78   :  { %v76_v18 = vpop.permute.xlu2 %75 }
  0x79   :  { %v48_v48 = vadd.s32 %v46_v45, %v36_v41  ;;  %vm80_vm14 = vcmp.eq.s32.totalorder %v76_v18, %v15_v23 }
  0x7a   :  { %v82_v56 = vsel %vm80_vm14, 1, %v224_v2 }
  0x7c   :  { %v31_v20 = vpop.permute.xlu1 %30  ;;  %v21_v21 = vpop.permute.xlu0 %20 }
  0x7d   :  { %vm33_vm0 = vcmp.eq.s32.totalorder %v31_v20, %v15_v23  ;;  %vm23_vm1 = vcmp.eq.s32.totalorder %v21_v21, %v15_v23 }
  0x7e   :  { %v35_v26 = vsel %vm33_vm0, 1, %v224_v2  ;;  %v25_v27 = vsel %vm23_vm1, 1, %v224_v2 }
  0x7f   :  { %v37_v29 = vadd.s32 %v35_v26, %v25_v27 }
  0x81   :  { %v91_v24 = vpop.permute.xlu2 %90  ;;  %v49_v32 = vadd.s32 %v47_v30, %v37_v29 }
  0x82   :  { %vm93_vm6 = vcmp.eq.s32.totalorder %v91_v24, %v15_v23 }
  0x83   :  { %v95_v43 = vsel %vm93_vm6, 1, %v224_v2 }
  0x85   :  { %v55_v25 = vpop.permute.xlu1 %54  ;;  %v52_v28 = vpop.permute.xlu0 %51 }
  0x86   :  { %vm57_vm3 = vcmp.eq.s32.totalorder %v55_v25, %v15_v23  ;;  %vm56_vm10 = vcmp.eq.s32.totalorder %v52_v28, %v15_v23 }
  0x87   :  { %v59_v31 = vsel %vm57_vm3, 1, %v224_v2  ;;  %v58_v46 = vsel %vm56_vm10, 1, %v224_v2 }
  0x88   :  { %v61_v38 = vadd.s32 %v59_v31, %v49_v32  ;;  %v60_v50 = vadd.s32 %v58_v46, %v48_v48 }
  0x8a   :  { %v103_v33 = vpop.permute.xlu2 %102  ;;  %v72_v55 = vadd.s32 %v70_v54, %v60_v50 }
  0x8b   :  { %vm105_vm11 = vcmp.eq.s32.totalorder %v103_v33, %v15_v23 }
  0x8c   :  { %v107_v47 = vsel %vm105_vm11, 1, %v224_v2  ;;  %v84_v58 = vadd.s32 %v82_v56, %v72_v55 }
  0x8e   :  { %v67_v36 = vpop.permute.xlu1 %66  ;;  %v79_v37 = vpop.permute.xlu0 %78 }
  0x8f   :  { %vm69_vm7 = vcmp.eq.s32.totalorder %v67_v36, %v15_v23  ;;  %vm81_vm8 = vcmp.eq.s32.totalorder %v79_v37, %v15_v23 }
  0x90   :  { %v71_v39 = vsel %vm69_vm7, 1, %v224_v2  ;;  %v83_v40 = vsel %vm81_vm8, 1, %v224_v2 }
  0x91   :  { %v73_v42 = vadd.s32 %v71_v39, %v61_v38 }
  0x93   :  { %v85_v44 = vadd.s32 %v83_v40, %v73_v42 }
  0x95   :  { %v97_v49 = vadd.s32 %v95_v43, %v85_v44 }
  0x97   :  { %v109_v51 = vadd.s32 %v107_v47, %v97_v49  ;;  %v88_v52 = vpop.permute.xlu1 %87 }
  0x98   :  { %vm92_vm15 = vcmp.eq.s32.totalorder %v88_v52, %v15_v23 }
  0x99   :  { %v111_v53 = vcvt.s32.f32 %v109_v51  ;;  %v94_v57 = vsel %vm92_vm15, 1, %v224_v2 }
  0x9a   :  { %v96_v60 = vadd.s32 %v94_v57, %v84_v58 }
  0x9b   :  { %167 = vmatmul.msk.f32.vlgmr.msra.gmra.mxu1 %vm116_vm13, %v111_v53 }
  0xa0   :  { %v100_v59 = vpop.permute.xlu1 %99 }
  0xa1   :  { %vm104_vm0 = vcmp.eq.s32.totalorder %v100_v59, %v15_v23 }
  0xa2   :  { %v106_v61 = vsel %vm104_vm0, 1, %v224_v2 }
  0xa3   :  { %v108_v62 = vadd.s32 %v106_v61, %v96_v60 }
  0xa5   :  { %v110_v63 = vcvt.s32.f32 %v108_v62 }
  0xa7   :  { %166 = vmatmul.msk.f32.vlgmr.msra.gmra.mxu0 %vm116_vm13, %v110_v63 }
 0x118   :  { %v143_v0 = vpop.f32.mrf.mxu1 }
 0x119   :  { %147 = vst [vmem:[#allocation2 + $0x8] sm:$0xff] %v143_v0 }
 0x124   :  { %v140_v1 = vpop.f32.mrf.mxu0 }
 0x125   :  { %146 = vst [vmem:[#allocation2] sm:$0xff] %v140_v1 }
 0x126   :  { %160 = dma.vmem_to_hbm [thread:$0]  %s153_s20, 256, %s155_s23, [#allocation3], %s232_s24, %s232_s24, %s233_s25  }
 0x127   :  { %221 = dma.done.wait [#allocation3], 256  }
 0x128   :  { %222 = vsyncadd [#allocation3], 4294967040 }
 0x129   :  { %165 = vsyncpa [#allocation3], 1 }

</bundles_post_ra>
